<compile_context>
chip_gen: v7x
topology: tpu7x:2x2x1
jax: 0.10.0
libtpu: 0.0.40
codegen_flags: <defaults>
</compile_context>

<pallas_src>
import functools

import jax
import jax.numpy as jnp
from jax.experimental import pallas as pl
from jax.experimental.pallas import tpu as pltpu


def _conv_block_kernel(x_ref, w1_ref, b1_ref, w2_ref, b2_ref, g_ref, beta_ref,
                       o_ref, *, batch: int, seq: int, k1: int, k2: int,
                       eps: float):
    # Block shapes (all blocks are full arrays, VMEM-resident, single grid step):
    #   x_ref    : (B*T, C)    f32   residual + conv-1 input (read once)
    #   w1_ref   : (K1, C, H)  bf16  per-tap conv-1 weights
    #   w2_ref   : (K2, H, C)  bf16  per-tap conv-2 weights
    #   b1_ref   : (1, H) f32 ; b2_ref / g_ref / beta_ref : (1, C) f32
    rows = batch * seq
    x = x_ref[...]                                            # (B*T, C) f32

    # Row index within its batch; masks taps that would cross a batch boundary
    # (or fall into the 'same' padding region).
    local_t = jax.lax.broadcasted_iota(jnp.int32, (rows, 1), 0) % seq

    def shifted_bf16(v, d):
        # Row r of the result sees v[r + d] *within its own batch*, 0 outside.
        # Sublane rotate on the XLU (f32 path), mask on the VPU, then one bf16
        # cast right before the MXU dot.
        s = (-d) % rows                                       # static, non-negative
        rv = v if s == 0 else pltpu.roll(v, shift=s, axis=0)
        valid = (local_t + d >= 0) & (local_t + d < seq)      # (rows, 1) bool
        return jnp.where(valid, rv, 0.0).astype(jnp.bfloat16)

    # ---- Conv1d #1 ('same'): K1 accumulated MXU matmuls over rolled x ----
    lp1 = (k1 - 1) // 2
    h = None
    for k in range(k1):                                       # static, K1 is tiny
        acc = jnp.dot(shifted_bf16(x, k - lp1), w1_ref[k],
                      preferred_element_type=jnp.float32)     # (B*T, H) f32 accum
        h = acc if h is None else h + acc
    h = jnp.maximum(h + b1_ref[...], 0.0)                     # bias + ReLU (f32 VPU)

    # ---- Conv1d #2 ('same'): K2 accumulated MXU matmuls over rolled h ----
    lp2 = (k2 - 1) // 2
    y = None
    for k in range(k2):                                       # static, K2 is tiny
        acc = jnp.dot(shifted_bf16(h, k - lp2), w2_ref[k],
                      preferred_element_type=jnp.float32)     # (B*T, C) f32 accum
        y = acc if y is None else y + acc
    y = y + b2_ref[...]

    # ---- residual (dropout = identity in eval) + LayerNorm over C (f32) ----
    z = x + y
    c_inv = 1.0 / z.shape[-1]
    mu = jnp.sum(z, axis=-1, keepdims=True) * c_inv           # two independent
    ez2 = jnp.sum(z * z, axis=-1, keepdims=True) * c_inv      # reductions, fused pass
    var = ez2 - mu * mu
    zn = (z - mu) * jax.lax.rsqrt(var + eps)
    o_ref[...] = (zn * g_ref[...] + beta_ref[...]).astype(o_ref.dtype)


def conv_block(x, w1, b1, w2, b2, gamma, beta, *, eps=1e-5):
    """x: (B, T, C).  w1: (H, C, K1), b1: (H,), w2: (C, H, K2), b2: (C,),
    gamma/beta: (C,)  -- PyTorch Conv1d / LayerNorm parameter shapes."""
    B, T, C = x.shape
    H, Cin, K1 = w1.shape
    Cout, Hin, K2 = w2.shape
    assert Cin == C and Hin == H and Cout == C

    # Parameter-side layout only (tiny, once-per-call): taps leading so the
    # kernel indexes a (in, out) slice per tap.  (out, in, k) -> (k, in, out).
    w1_taps = jnp.transpose(w1, (2, 1, 0)).astype(jnp.bfloat16)      # (K1, C, H)
    w2_taps = jnp.transpose(w2, (2, 1, 0)).astype(jnp.bfloat16)      # (K2, H, C)

    # Single x input: free contiguous reshape, no im2col, no extra copies.
    x_rows = x.reshape(B * T, C).astype(jnp.float32)                 # (B*T, C)

    kernel = functools.partial(_conv_block_kernel, batch=B, seq=T,
                               k1=K1, k2=K2, eps=eps)

    flops = 2 * B * T * (K1 * C * H + K2 * H * C)
    bytes_accessed = int(
        x_rows.size * 4 + w1_taps.size * 2 + w2_taps.size * 2
        + (H + 3 * C) * 4 + B * T * C * 4)
    cost = pl.CostEstimate(flops=flops, transcendentals=B * T,
                           bytes_accessed=bytes_accessed)

    vmem = pl.BlockSpec(memory_space=pltpu.MemorySpace.VMEM)
    out = pl.pallas_call(
        kernel,
        out_shape=jax.ShapeDtypeStruct((B * T, C), x.dtype),
        in_specs=[vmem] * 7,
        out_specs=vmem,
        cost_estimate=cost,
    )(x_rows, w1_taps,
      b1[None, :].astype(jnp.float32), w2_taps, b2[None, :].astype(jnp.float32),
      gamma[None, :].astype(jnp.float32), beta[None, :].astype(jnp.float32))

    return out.reshape(B, T, C)


def _reference(x, w1, b1, w2, b2, gamma, beta, eps=1e-5):
    """Pure-JAX f32 reference mirroring the PyTorch forward (eval mode)."""
    def conv1d_same(x_bct, w, b):
        k = w.shape[2]
        tot = k - 1
        lp = tot // 2
        y = jax.lax.conv_general_dilated(
            x_bct, w, window_strides=(1,), padding=[(lp, tot - lp)],
            dimension_numbers=("NCH", "OIH", "NCH"))
        return y + b[None, :, None]

    xt = jnp.transpose(x, (0, 2, 1))                 # (B, C, T)
    h = jax.nn.relu(conv1d_same(xt, w1, b1))
    y = conv1d_same(h, w2, b2)
    y = jnp.transpose(y, (0, 2, 1))                  # (B, T, C)
    z = x + y
    mu = z.mean(-1, keepdims=True)
    var = ((z - mu) ** 2).mean(-1, keepdims=True)
    return (z - mu) / jnp.sqrt(var + eps) * gamma + beta


if __name__ == "__main__":
    # Module hyperparameters (small, consistent with the forward pass)
    input_size, hidden_size = 8, 32
    kernel_size_1, kernel_size_2 = 3, 5
    B, T = 2, 16

    key = jax.random.PRNGKey(0)
    kx, k1w, k1b, k2w, k2b, kg, kb = jax.random.split(key, 7)

    x = jax.random.normal(kx, (B, T, input_size), jnp.float32)

    # Deterministic parameter init (PyTorch Conv1d weight shape: (out, in, k))
    w1 = 0.1 * jax.random.normal(k1w, (hidden_size, input_size, kernel_size_1), jnp.float32)
    b1 = 0.1 * jax.random.normal(k1b, (hidden_size,), jnp.float32)
    w2 = 0.1 * jax.random.normal(k2w, (input_size, hidden_size, kernel_size_2), jnp.float32)
    b2 = 0.1 * jax.random.normal(k2b, (input_size,), jnp.float32)
    gamma = 1.0 + 0.1 * jax.random.normal(kg, (input_size,), jnp.float32)  # LayerNorm weight
    beta = 0.1 * jax.random.normal(kb, (input_size,), jnp.float32)         # LayerNorm bias

    out = conv_block(x, w1, b1, w2, b2, gamma, beta)
    out = jax.block_until_ready(out)

    ref = _reference(x, w1, b1, w2, b2, gamma, beta)
    assert out.shape == (B, T, input_size)
    # bf16 MXU operands (f32 accumulation) vs f32 reference -> loosened tolerance.
    # NOTE: intentional eval-mode precision reduction; tighten by keeping f32 dots
    # if this kernel is reused for training / strict-comparison paths.
    assert jnp.allclose(out, ref, rtol=2e-2, atol=2e-2), "mismatch vs reference"

    print("KERNEL_OK")
</pallas_src>

<mosaic_0001>
module attributes {stable_mosaic.version = 11 : i64} {
  func.func @_conv_block_kernel(%arg0: memref<32x8xf32, #tpu.memory_space<vmem>>, %arg1: memref<3x8x32xbf16, #tpu.memory_space<vmem>>, %arg2: memref<1x32xf32, #tpu.memory_space<vmem>>, %arg3: memref<5x32x8xbf16, #tpu.memory_space<vmem>>, %arg4: memref<1x8xf32, #tpu.memory_space<vmem>>, %arg5: memref<1x8xf32, #tpu.memory_space<vmem>>, %arg6: memref<1x8xf32, #tpu.memory_space<vmem>>, %arg7: memref<32x8xf32, #tpu.memory_space<vmem>>) attributes {dimension_semantics = [], scalar_prefetch = 0 : i64, scratch_operands = 0 : i64, tpu.core_type = #tpu.core_type<tc>} {
    %c0 = arith.constant 0 : index
    %c0_0 = arith.constant 0 : index
    %0 = vector.load %arg0[%c0, %c0_0] : memref<32x8xf32, #tpu.memory_space<vmem>>, vector<32x8xf32>
    %1 = tpu.iota {dimensions = array<i32: 0>} : vector<32x1xi32>
    %c16_i32 = arith.constant 16 : i32
    %c0_i32 = arith.constant 0 : i32
    %2 = arith.cmpi eq, %c16_i32, %c0_i32 : i32
    %c1_i32 = arith.constant 1 : i32
    %3 = arith.select %2, %c1_i32, %c16_i32 : i32
    %4 = vector.broadcast %3 : i32 to vector<32x1xi32>
    %5 = arith.remsi %1, %4 : vector<32x1xi32>
    %c0_i32_1 = arith.constant 0 : i32
    %6 = vector.broadcast %c0_i32_1 : i32 to vector<32x1xi32>
    %7 = arith.cmpi ne, %5, %6 : vector<32x1xi32>
    %c0_i32_2 = arith.constant 0 : i32
    %8 = vector.broadcast %c0_i32_2 : i32 to vector<32x1xi32>
    %9 = arith.cmpi slt, %5, %8 : vector<32x1xi32>
    %c0_i32_3 = arith.constant 0 : i32
    %10 = arith.cmpi slt, %3, %c0_i32_3 : i32
    %11 = vector.broadcast %10 : i1 to vector<32x1xi1>
    %12 = vector.broadcast %11 : vector<32x1xi1> to vector<32x1xi1>
    %13 = arith.xori %9, %12 : vector<32x1xi1>
    %14 = arith.andi %13, %7 : vector<32x1xi1>
    %15 = vector.broadcast %3 : i32 to vector<32x1xi32>
    %16 = arith.addi %5, %15 : vector<32x1xi32>
    %17 = arith.select %14, %16, %5 : vector<32x1xi1>, vector<32x1xi32>
    %c1_i32_4 = arith.constant 1 : i32
    %18 = tpu.dynamic_rotate %0 by %c1_i32_4 dim 0 : vector<32x8xf32>, i32 -> vector<32x8xf32>
    %c-1_i32 = arith.constant -1 : i32
    %19 = vector.broadcast %c-1_i32 : i32 to vector<32x1xi32>
    %20 = arith.addi %17, %19 : vector<32x1xi32>
    %c0_i32_5 = arith.constant 0 : i32
    %21 = vector.broadcast %c0_i32_5 : i32 to vector<32x1xi32>
    %22 = arith.cmpi sge, %20, %21 : vector<32x1xi32>
    %c-1_i32_6 = arith.constant -1 : i32
    %23 = vector.broadcast %c-1_i32_6 : i32 to vector<32x1xi32>
    %24 = arith.addi %17, %23 : vector<32x1xi32>
    %c16_i32_7 = arith.constant 16 : i32
    %25 = vector.broadcast %c16_i32_7 : i32 to vector<32x1xi32>
    %26 = arith.cmpi slt, %24, %25 : vector<32x1xi32>
    %27 = arith.andi %22, %26 : vector<32x1xi1>
    %cst = arith.constant 0.000000e+00 : f32
    %28 = vector.shape_cast %27 : vector<32x1xi1> to vector<32x1xi1>
    %29 = vector.broadcast %28 : vector<32x1xi1> to vector<32x8xi1>
    %30 = vector.broadcast %cst : f32 to vector<32x8xf32>
    %31 = arith.select %29, %18, %30 : vector<32x8xi1>, vector<32x8xf32>
    %32 = arith.truncf %31 : vector<32x8xf32> to vector<32x8xbf16>
    %c0_8 = arith.constant 0 : index
    %c0_9 = arith.constant 0 : index
    %c0_10 = arith.constant 0 : index
    %33 = vector.load %arg1[%c0_8, %c0_9, %c0_10] : memref<3x8x32xbf16, #tpu.memory_space<vmem>>, vector<1x8x32xbf16>
    %34 = vector.shape_cast %33 : vector<1x8x32xbf16> to vector<8x32xbf16>
    %cst_11 = arith.constant dense<0.000000e+00> : vector<32x32xf32>
    %35 = tpu.matmul %32, %34, %cst_11 {dimension_numbers = #tpu.dot_dimension_numbers<[1], [0], [0], [1], [0, 0, 1, 1], [], []>} : vector<32x8xbf16>, vector<8x32xbf16>, vector<32x32xf32> -> vector<32x32xf32>
    %c0_i32_12 = arith.constant 0 : i32
    %36 = vector.broadcast %c0_i32_12 : i32 to vector<32x1xi32>
    %37 = arith.addi %17, %36 : vector<32x1xi32>
    %c0_i32_13 = arith.constant 0 : i32
    %38 = vector.broadcast %c0_i32_13 : i32 to vector<32x1xi32>
    %39 = arith.cmpi sge, %37, %38 : vector<32x1xi32>
    %c0_i32_14 = arith.constant 0 : i32
    %40 = vector.broadcast %c0_i32_14 : i32 to vector<32x1xi32>
    %41 = arith.addi %17, %40 : vector<32x1xi32>
    %c16_i32_15 = arith.constant 16 : i32
    %42 = vector.broadcast %c16_i32_15 : i32 to vector<32x1xi32>
    %43 = arith.cmpi slt, %41, %42 : vector<32x1xi32>
    %44 = arith.andi %39, %43 : vector<32x1xi1>
    %cst_16 = arith.constant 0.000000e+00 : f32
    %45 = vector.shape_cast %44 : vector<32x1xi1> to vector<32x1xi1>
    %46 = vector.broadcast %45 : vector<32x1xi1> to vector<32x8xi1>
    %47 = vector.broadcast %cst_16 : f32 to vector<32x8xf32>
    %48 = arith.select %46, %0, %47 : vector<32x8xi1>, vector<32x8xf32>
    %49 = arith.truncf %48 : vector<32x8xf32> to vector<32x8xbf16>
    %c1 = arith.constant 1 : index
    %c0_17 = arith.constant 0 : index
    %c0_18 = arith.constant 0 : index
    %50 = vector.load %arg1[%c1, %c0_17, %c0_18] : memref<3x8x32xbf16, #tpu.memory_space<vmem>>, vector<1x8x32xbf16>
    %51 = vector.shape_cast %50 : vector<1x8x32xbf16> to vector<8x32xbf16>
    %cst_19 = arith.constant dense<0.000000e+00> : vector<32x32xf32>
    %52 = tpu.matmul %49, %51, %cst_19 {dimension_numbers = #tpu.dot_dimension_numbers<[1], [0], [0], [1], [0, 0, 1, 1], [], []>} : vector<32x8xbf16>, vector<8x32xbf16>, vector<32x32xf32> -> vector<32x32xf32>
    %53 = arith.addf %35, %52 : vector<32x32xf32>
    %c31_i32 = arith.constant 31 : i32
    %54 = tpu.dynamic_rotate %0 by %c31_i32 dim 0 : vector<32x8xf32>, i32 -> vector<32x8xf32>
    %c1_i32_20 = arith.constant 1 : i32
    %55 = vector.broadcast %c1_i32_20 : i32 to vector<32x1xi32>
    %56 = arith.addi %17, %55 : vector<32x1xi32>
    %c0_i32_21 = arith.constant 0 : i32
    %57 = vector.broadcast %c0_i32_21 : i32 to vector<32x1xi32>
    %58 = arith.cmpi sge, %56, %57 : vector<32x1xi32>
    %c1_i32_22 = arith.constant 1 : i32
    %59 = vector.broadcast %c1_i32_22 : i32 to vector<32x1xi32>
    %60 = arith.addi %17, %59 : vector<32x1xi32>
    %c16_i32_23 = arith.constant 16 : i32
    %61 = vector.broadcast %c16_i32_23 : i32 to vector<32x1xi32>
    %62 = arith.cmpi slt, %60, %61 : vector<32x1xi32>
    %63 = arith.andi %58, %62 : vector<32x1xi1>
    %cst_24 = arith.constant 0.000000e+00 : f32
    %64 = vector.shape_cast %63 : vector<32x1xi1> to vector<32x1xi1>
    %65 = vector.broadcast %64 : vector<32x1xi1> to vector<32x8xi1>
    %66 = vector.broadcast %cst_24 : f32 to vector<32x8xf32>
    %67 = arith.select %65, %54, %66 : vector<32x8xi1>, vector<32x8xf32>
    %68 = arith.truncf %67 : vector<32x8xf32> to vector<32x8xbf16>
    %c2 = arith.constant 2 : index
    %c0_25 = arith.constant 0 : index
    %c0_26 = arith.constant 0 : index
    %69 = vector.load %arg1[%c2, %c0_25, %c0_26] : memref<3x8x32xbf16, #tpu.memory_space<vmem>>, vector<1x8x32xbf16>
    %70 = vector.shape_cast %69 : vector<1x8x32xbf16> to vector<8x32xbf16>
    %cst_27 = arith.constant dense<0.000000e+00> : vector<32x32xf32>
    %71 = tpu.matmul %68, %70, %cst_27 {dimension_numbers = #tpu.dot_dimension_numbers<[1], [0], [0], [1], [0, 0, 1, 1], [], []>} : vector<32x8xbf16>, vector<8x32xbf16>, vector<32x32xf32> -> vector<32x32xf32>
    %72 = arith.addf %53, %71 : vector<32x32xf32>
    %c0_28 = arith.constant 0 : index
    %c0_29 = arith.constant 0 : index
    %73 = vector.load %arg2[%c0_28, %c0_29] : memref<1x32xf32, #tpu.memory_space<vmem>>, vector<1x32xf32>
    %74 = vector.broadcast %73 : vector<1x32xf32> to vector<32x32xf32>
    %75 = arith.addf %72, %74 : vector<32x32xf32>
    %cst_30 = arith.constant 0.000000e+00 : f32
    %76 = vector.broadcast %cst_30 : f32 to vector<32x32xf32>
    %77 = arith.maximumf %75, %76 : vector<32x32xf32>
    %c2_i32 = arith.constant 2 : i32
    %78 = tpu.dynamic_rotate %77 by %c2_i32 dim 0 : vector<32x32xf32>, i32 -> vector<32x32xf32>
    %c-2_i32 = arith.constant -2 : i32
    %79 = vector.broadcast %c-2_i32 : i32 to vector<32x1xi32>
    %80 = arith.addi %17, %79 : vector<32x1xi32>
    %c0_i32_31 = arith.constant 0 : i32
    %81 = vector.broadcast %c0_i32_31 : i32 to vector<32x1xi32>
    %82 = arith.cmpi sge, %80, %81 : vector<32x1xi32>
    %c-2_i32_32 = arith.constant -2 : i32
    %83 = vector.broadcast %c-2_i32_32 : i32 to vector<32x1xi32>
    %84 = arith.addi %17, %83 : vector<32x1xi32>
    %c16_i32_33 = arith.constant 16 : i32
    %85 = vector.broadcast %c16_i32_33 : i32 to vector<32x1xi32>
    %86 = arith.cmpi slt, %84, %85 : vector<32x1xi32>
    %87 = arith.andi %82, %86 : vector<32x1xi1>
    %cst_34 = arith.constant 0.000000e+00 : f32
    %88 = vector.shape_cast %87 : vector<32x1xi1> to vector<32x1xi1>
    %89 = vector.broadcast %88 : vector<32x1xi1> to vector<32x32xi1>
    %90 = vector.broadcast %cst_34 : f32 to vector<32x32xf32>
    %91 = arith.select %89, %78, %90 : vector<32x32xi1>, vector<32x32xf32>
    %92 = arith.truncf %91 : vector<32x32xf32> to vector<32x32xbf16>
    %c0_35 = arith.constant 0 : index
    %c0_36 = arith.constant 0 : index
    %c0_37 = arith.constant 0 : index
    %93 = vector.load %arg3[%c0_35, %c0_36, %c0_37] : memref<5x32x8xbf16, #tpu.memory_space<vmem>>, vector<1x32x8xbf16>
    %94 = vector.shape_cast %93 : vector<1x32x8xbf16> to vector<32x8xbf16>
    %cst_38 = arith.constant dense<0.000000e+00> : vector<32x8xf32>
    %95 = tpu.matmul %92, %94, %cst_38 {dimension_numbers = #tpu.dot_dimension_numbers<[1], [0], [0], [1], [0, 0, 1, 1], [], []>} : vector<32x32xbf16>, vector<32x8xbf16>, vector<32x8xf32> -> vector<32x8xf32>
    %c1_i32_39 = arith.constant 1 : i32
    %96 = tpu.dynamic_rotate %77 by %c1_i32_39 dim 0 : vector<32x32xf32>, i32 -> vector<32x32xf32>
    %c-1_i32_40 = arith.constant -1 : i32
    %97 = vector.broadcast %c-1_i32_40 : i32 to vector<32x1xi32>
    %98 = arith.addi %17, %97 : vector<32x1xi32>
    %c0_i32_41 = arith.constant 0 : i32
    %99 = vector.broadcast %c0_i32_41 : i32 to vector<32x1xi32>
    %100 = arith.cmpi sge, %98, %99 : vector<32x1xi32>
    %c-1_i32_42 = arith.constant -1 : i32
    %101 = vector.broadcast %c-1_i32_42 : i32 to vector<32x1xi32>
    %102 = arith.addi %17, %101 : vector<32x1xi32>
    %c16_i32_43 = arith.constant 16 : i32
    %103 = vector.broadcast %c16_i32_43 : i32 to vector<32x1xi32>
    %104 = arith.cmpi slt, %102, %103 : vector<32x1xi32>
    %105 = arith.andi %100, %104 : vector<32x1xi1>
    %cst_44 = arith.constant 0.000000e+00 : f32
    %106 = vector.shape_cast %105 : vector<32x1xi1> to vector<32x1xi1>
    %107 = vector.broadcast %106 : vector<32x1xi1> to vector<32x32xi1>
    %108 = vector.broadcast %cst_44 : f32 to vector<32x32xf32>
    %109 = arith.select %107, %96, %108 : vector<32x32xi1>, vector<32x32xf32>
    %110 = arith.truncf %109 : vector<32x32xf32> to vector<32x32xbf16>
    %c1_45 = arith.constant 1 : index
    %c0_46 = arith.constant 0 : index
    %c0_47 = arith.constant 0 : index
    %111 = vector.load %arg3[%c1_45, %c0_46, %c0_47] : memref<5x32x8xbf16, #tpu.memory_space<vmem>>, vector<1x32x8xbf16>
    %112 = vector.shape_cast %111 : vector<1x32x8xbf16> to vector<32x8xbf16>
    %cst_48 = arith.constant dense<0.000000e+00> : vector<32x8xf32>
    %113 = tpu.matmul %110, %112, %cst_48 {dimension_numbers = #tpu.dot_dimension_numbers<[1], [0], [0], [1], [0, 0, 1, 1], [], []>} : vector<32x32xbf16>, vector<32x8xbf16>, vector<32x8xf32> -> vector<32x8xf32>
    %114 = arith.addf %95, %113 : vector<32x8xf32>
    %c0_i32_49 = arith.constant 0 : i32
    %115 = vector.broadcast %c0_i32_49 : i32 to vector<32x1xi32>
    %116 = arith.addi %17, %115 : vector<32x1xi32>
    %c0_i32_50 = arith.constant 0 : i32
    %117 = vector.broadcast %c0_i32_50 : i32 to vector<32x1xi32>
    %118 = arith.cmpi sge, %116, %117 : vector<32x1xi32>
    %c0_i32_51 = arith.constant 0 : i32
    %119 = vector.broadcast %c0_i32_51 : i32 to vector<32x1xi32>
    %120 = arith.addi %17, %119 : vector<32x1xi32>
    %c16_i32_52 = arith.constant 16 : i32
    %121 = vector.broadcast %c16_i32_52 : i32 to vector<32x1xi32>
    %122 = arith.cmpi slt, %120, %121 : vector<32x1xi32>
    %123 = arith.andi %118, %122 : vector<32x1xi1>
    %cst_53 = arith.constant 0.000000e+00 : f32
    %124 = vector.shape_cast %123 : vector<32x1xi1> to vector<32x1xi1>
    %125 = vector.broadcast %124 : vector<32x1xi1> to vector<32x32xi1>
    %126 = vector.broadcast %cst_53 : f32 to vector<32x32xf32>
    %127 = arith.select %125, %77, %126 : vector<32x32xi1>, vector<32x32xf32>
    %128 = arith.truncf %127 : vector<32x32xf32> to vector<32x32xbf16>
    %c2_54 = arith.constant 2 : index
    %c0_55 = arith.constant 0 : index
    %c0_56 = arith.constant 0 : index
    %129 = vector.load %arg3[%c2_54, %c0_55, %c0_56] : memref<5x32x8xbf16, #tpu.memory_space<vmem>>, vector<1x32x8xbf16>
    %130 = vector.shape_cast %129 : vector<1x32x8xbf16> to vector<32x8xbf16>
    %cst_57 = arith.constant dense<0.000000e+00> : vector<32x8xf32>
    %131 = tpu.matmul %128, %130, %cst_57 {dimension_numbers = #tpu.dot_dimension_numbers<[1], [0], [0], [1], [0, 0, 1, 1], [], []>} : vector<32x32xbf16>, vector<32x8xbf16>, vector<32x8xf32> -> vector<32x8xf32>
    %132 = arith.addf %114, %131 : vector<32x8xf32>
    %c31_i32_58 = arith.constant 31 : i32
    %133 = tpu.dynamic_rotate %77 by %c31_i32_58 dim 0 : vector<32x32xf32>, i32 -> vector<32x32xf32>
    %c1_i32_59 = arith.constant 1 : i32
    %134 = vector.broadcast %c1_i32_59 : i32 to vector<32x1xi32>
    %135 = arith.addi %17, %134 : vector<32x1xi32>
    %c0_i32_60 = arith.constant 0 : i32
    %136 = vector.broadcast %c0_i32_60 : i32 to vector<32x1xi32>
    %137 = arith.cmpi sge, %135, %136 : vector<32x1xi32>
    %c1_i32_61 = arith.constant 1 : i32
    %138 = vector.broadcast %c1_i32_61 : i32 to vector<32x1xi32>
    %139 = arith.addi %17, %138 : vector<32x1xi32>
    %c16_i32_62 = arith.constant 16 : i32
    %140 = vector.broadcast %c16_i32_62 : i32 to vector<32x1xi32>
    %141 = arith.cmpi slt, %139, %140 : vector<32x1xi32>
    %142 = arith.andi %137, %141 : vector<32x1xi1>
    %cst_63 = arith.constant 0.000000e+00 : f32
    %143 = vector.shape_cast %142 : vector<32x1xi1> to vector<32x1xi1>
    %144 = vector.broadcast %143 : vector<32x1xi1> to vector<32x32xi1>
    %145 = vector.broadcast %cst_63 : f32 to vector<32x32xf32>
    %146 = arith.select %144, %133, %145 : vector<32x32xi1>, vector<32x32xf32>
    %147 = arith.truncf %146 : vector<32x32xf32> to vector<32x32xbf16>
    %c3 = arith.constant 3 : index
    %c0_64 = arith.constant 0 : index
    %c0_65 = arith.constant 0 : index
    %148 = vector.load %arg3[%c3, %c0_64, %c0_65] : memref<5x32x8xbf16, #tpu.memory_space<vmem>>, vector<1x32x8xbf16>
    %149 = vector.shape_cast %148 : vector<1x32x8xbf16> to vector<32x8xbf16>
    %cst_66 = arith.constant dense<0.000000e+00> : vector<32x8xf32>
    %150 = tpu.matmul %147, %149, %cst_66 {dimension_numbers = #tpu.dot_dimension_numbers<[1], [0], [0], [1], [0, 0, 1, 1], [], []>} : vector<32x32xbf16>, vector<32x8xbf16>, vector<32x8xf32> -> vector<32x8xf32>
    %151 = arith.addf %132, %150 : vector<32x8xf32>
    %c30_i32 = arith.constant 30 : i32
    %152 = tpu.dynamic_rotate %77 by %c30_i32 dim 0 : vector<32x32xf32>, i32 -> vector<32x32xf32>
    %c2_i32_67 = arith.constant 2 : i32
    %153 = vector.broadcast %c2_i32_67 : i32 to vector<32x1xi32>
    %154 = arith.addi %17, %153 : vector<32x1xi32>
    %c0_i32_68 = arith.constant 0 : i32
    %155 = vector.broadcast %c0_i32_68 : i32 to vector<32x1xi32>
    %156 = arith.cmpi sge, %154, %155 : vector<32x1xi32>
    %c2_i32_69 = arith.constant 2 : i32
    %157 = vector.broadcast %c2_i32_69 : i32 to vector<32x1xi32>
    %158 = arith.addi %17, %157 : vector<32x1xi32>
    %c16_i32_70 = arith.constant 16 : i32
    %159 = vector.broadcast %c16_i32_70 : i32 to vector<32x1xi32>
    %160 = arith.cmpi slt, %158, %159 : vector<32x1xi32>
    %161 = arith.andi %156, %160 : vector<32x1xi1>
    %cst_71 = arith.constant 0.000000e+00 : f32
    %162 = vector.shape_cast %161 : vector<32x1xi1> to vector<32x1xi1>
    %163 = vector.broadcast %162 : vector<32x1xi1> to vector<32x32xi1>
    %164 = vector.broadcast %cst_71 : f32 to vector<32x32xf32>
    %165 = arith.select %163, %152, %164 : vector<32x32xi1>, vector<32x32xf32>
    %166 = arith.truncf %165 : vector<32x32xf32> to vector<32x32xbf16>
    %c4 = arith.constant 4 : index
    %c0_72 = arith.constant 0 : index
    %c0_73 = arith.constant 0 : index
    %167 = vector.load %arg3[%c4, %c0_72, %c0_73] : memref<5x32x8xbf16, #tpu.memory_space<vmem>>, vector<1x32x8xbf16>
    %168 = vector.shape_cast %167 : vector<1x32x8xbf16> to vector<32x8xbf16>
    %cst_74 = arith.constant dense<0.000000e+00> : vector<32x8xf32>
    %169 = tpu.matmul %166, %168, %cst_74 {dimension_numbers = #tpu.dot_dimension_numbers<[1], [0], [0], [1], [0, 0, 1, 1], [], []>} : vector<32x32xbf16>, vector<32x8xbf16>, vector<32x8xf32> -> vector<32x8xf32>
    %170 = arith.addf %151, %169 : vector<32x8xf32>
    %c0_75 = arith.constant 0 : index
    %c0_76 = arith.constant 0 : index
    %171 = vector.load %arg4[%c0_75, %c0_76] : memref<1x8xf32, #tpu.memory_space<vmem>>, vector<1x8xf32>
    %172 = vector.broadcast %171 : vector<1x8xf32> to vector<32x8xf32>
    %173 = arith.addf %170, %172 : vector<32x8xf32>
    %174 = arith.addf %0, %173 : vector<32x8xf32>
    %cst_77 = arith.constant dense<0.000000e+00> : vector<32xf32>
    %175 = vector.multi_reduction <add>, %174, %cst_77 [1] : vector<32x8xf32> to vector<32xf32>
    %176 = vector.shape_cast %175 : vector<32xf32> to vector<32x1xf32>
    %cst_78 = arith.constant 1.250000e-01 : f32
    %177 = vector.broadcast %cst_78 : f32 to vector<32x1xf32>
    %178 = arith.mulf %176, %177 : vector<32x1xf32>
    %179 = arith.mulf %174, %174 : vector<32x8xf32>
    %cst_79 = arith.constant dense<0.000000e+00> : vector<32xf32>
    %180 = vector.multi_reduction <add>, %179, %cst_79 [1] : vector<32x8xf32> to vector<32xf32>
    %181 = vector.shape_cast %180 : vector<32xf32> to vector<32x1xf32>
    %cst_80 = arith.constant 1.250000e-01 : f32
    %182 = vector.broadcast %cst_80 : f32 to vector<32x1xf32>
    %183 = arith.mulf %181, %182 : vector<32x1xf32>
    %184 = arith.mulf %178, %178 : vector<32x1xf32>
    %185 = arith.subf %183, %184 : vector<32x1xf32>
    %186 = vector.broadcast %178 : vector<32x1xf32> to vector<32x8xf32>
    %187 = arith.subf %174, %186 : vector<32x8xf32>
    %cst_81 = arith.constant 9.99999974E-6 : f32
    %188 = vector.broadcast %cst_81 : f32 to vector<32x1xf32>
    %189 = arith.addf %185, %188 : vector<32x1xf32>
    %190 = math.rsqrt %189 : vector<32x1xf32>
    %191 = vector.broadcast %190 : vector<32x1xf32> to vector<32x8xf32>
    %192 = arith.mulf %187, %191 : vector<32x8xf32>
    %c0_82 = arith.constant 0 : index
    %c0_83 = arith.constant 0 : index
    %193 = vector.load %arg5[%c0_82, %c0_83] : memref<1x8xf32, #tpu.memory_space<vmem>>, vector<1x8xf32>
    %194 = vector.broadcast %193 : vector<1x8xf32> to vector<32x8xf32>
    %195 = arith.mulf %192, %194 : vector<32x8xf32>
    %c0_84 = arith.constant 0 : index
    %c0_85 = arith.constant 0 : index
    %196 = vector.load %arg6[%c0_84, %c0_85] : memref<1x8xf32, #tpu.memory_space<vmem>>, vector<1x8xf32>
    %197 = vector.broadcast %196 : vector<1x8xf32> to vector<32x8xf32>
    %198 = arith.addf %195, %197 : vector<32x8xf32>
    %c0_86 = arith.constant 0 : index
    %c0_87 = arith.constant 0 : index
    %199 = vector.load %arg7[%c0_86, %c0_87] : memref<32x8xf32, #tpu.memory_space<vmem>>, vector<32x8xf32>
    tpu.vector_store %arg7[%c0_86, %c0_87], %198 {strides = array<i32>} : memref<32x8xf32, #tpu.memory_space<vmem>>, vector<32x8xf32>,
    return
  }
}

</mosaic_0001>

<bundles_post_ra>
// kernel: tpu_custom_call.1
= control target key start
LH: loop header
LB: loop body
LE: loop exit
PB: predicated region body
PF: predicated region fallthrough
CT: control target
= control target key end

     0   :  { %vm159_vm0 = vcmask 1043456   ;;  %v31_v0 = vlaneseq  ;;  %vm152_vm1 = vcmask 64512   ;;  %vm462_vm9 = vcmask 261120   ;;  %s1474_s1 = inlined_call_operand.vmem [shape: bf16[3,8,32], index: 1, kind: input, shape index: {}]   ;;  %s1475_s0 = inlined_call_operand.vmem [shape: f32[32,8], index: 0, kind: input, shape index: {}]   ;;  %s1476_s3 = inlined_call_operand.vmem [shape: bf16[5,32,8], index: 3, kind: input, shape index: {}]   ;;  %s1477_s2 = inlined_call_operand.vmem [shape: f32[1,32], index: 2, kind: input, shape index: {}]   ;;  %s1478_s4 = inlined_call_operand.vmem [shape: f32[1,8], index: 4, kind: input, shape index: {}]   ;;  %s1479_s5 = inlined_call_operand.vmem [shape: f32[1,8], index: 5, kind: input, shape index: {}]   ;;  %s1480_s6 = inlined_call_operand.vmem [shape: f32[1,8], index: 6, kind: input, shape index: {}]   ;;  %s1481_s7 = inlined_call_operand.vmem [shape: f32[32,8], index: 7, kind: output, shape index: {}]  }
   0x1   :  { %v977_v1 = vld [vmem:[%s1474_s1 + $0x4] sm:$0xf]  ;;  %v1208_v3 = vld [vmem:[%s1475_s0 + $0x8] sm:$0xff]  ;;  %v1217_v6 = vld [vmem:[%s1475_s0 + $0x10] sm:$0xff] }
   0x2   :  { %v1203_v2 = vld [vmem:[%s1475_s0] sm:$0xff]  ;;  %1136 = vmatprep.subr.msk.bf16.mxu0 %vm159_vm0, %v977_v1  ;;  %v161_v4 = vsel %vm159_vm0, %v977_v1, 0  ;;  %v1222_v7 = vld [vmem:[%s1475_s0 + $0x18] sm:$0xff]  ;;  %v1233_v12 = vshrl.u32 %v31_v0, 7  ;;  %v85_v14 = vrot.slane %v1208_v3, 7  ;;  %v271_v15 = vrot.slane %v1208_v3, 1 }
   0x3   :  { %v148_v5 = vpack.c.bf16 %v1208_v3, %v1203_v2  ;;  %1055 = vmatpush3.bf16.msra.mxu0 %v161_v4  ;;  %v84_v8 = vrot.slane %v1203_v2, 7  ;;  %v149_v9 = vpack.c.bf16 %v1222_v7, %v1217_v6  ;;  %v123_v10 = vld [vmem:[%s1474_s1] sm:$0xf]  ;;  %v87_v13 = vrot.slane %v1222_v7, 7  ;;  %v982_v17 = vld [vmem:[%s1474_s1 + $0x8] sm:$0xf] }
   0x4   :  { %1137 = vmatprep.subr.msk.bf16.mxu0 %vm159_vm0, %v123_v10  ;;  %v219_v11 = vsel %vm159_vm0, %v123_v10, 0  ;;  %v86_v16 = vrot.slane %v1217_v6, 7  ;;  %v272_v18 = vrot.slane %v1217_v6, 1  ;;  %v40_v19 = vand.u32 15, %v1233_v12  ;;  %v1139_v49 = vld [vmem:[%s1476_s3 + $0x10] sm:$0xff]   ;;  %v1140_v50 = vld [vmem:[%s1476_s3] sm:$0xff]  }
   0x5   :  { %1056 = vmatprep.mubr.msk.bf16.mxu0 %vm152_vm1, %v148_v5  ;;  %vm88_vm2 = vcmp.lt.s32.totalorder %v1233_v12, 1  ;;  %v34_v20 = vadd.s32 16, %v1233_v12  ;;  %v1248_v21 = vadd.s32 8, %v1233_v12  ;;  %v270_v22 = vrot.slane %v1203_v2, 1  ;;  %1080 = vmatprep.subr.bf16.mxu1 %v1140_v50  ;;  %v1141_v51 = vld [vmem:[%s1476_s3 + $0x18] sm:$0xff]   ;;  %v1142_v52 = vld [vmem:[%s1476_s3 + $0x8] sm:$0xff]  }
   0x6   :  { %1057 = vmatmul.mubr.msk.bf16.vlgmr.msra.gmra.mrb[0].mxu0 %vm152_vm1, %v149_v9  ;;  %v92_v23 = vsel %vm88_vm2, %v87_v13, %v84_v8  ;;  %v1253_v24 = vadd.s32 4294967295, %v40_v19  ;;  %vm274_vm3 = vcmp.lt.s32.totalorder %v1233_v12, 7  ;;  %v91_v27 = vsel %vm88_vm2, %v84_v8, %v85_v14  ;;  %1081 = vmatpush3.bf16.msra.mxu1 %v1140_v50  ;;  %v1312_v53 = vld [vmem:[%s1476_s3 + $0x20] sm:$0xff]  }
   0x7   :  { %1061 = vmatpush3.bf16.msra.mxu0 %v219_v11  ;;  %v54_v25 = vand.u32 15, %v34_v20  ;;  %v47_v26 = vand.u32 15, %v1248_v21  ;;  %v90_v28 = vsel %vm88_vm2, %v85_v14, %v86_v16  ;;  %v35_v29 = vadd.s32 24, %v1233_v12  ;;  %1082 = vmatprep.subr.bf16.mxu1 %v1142_v52  ;;  %v985_v54 = vld [vmem:[%s1477_s2] ss:$0 sm:$0xff] }
   0x8   :  { %1138 = vmatprep.subr.msk.bf16.mxu0 %vm159_vm0, %v982_v17  ;;  %vm97_vm4 = vcmp.ge.s32.totalorder %v1253_v24, 0  ;;  %v276_v31 = vsel %vm274_vm3, %v271_v15, %v272_v18  ;;  %v89_v34 = vsel %vm88_vm2, %v86_v16, %v87_v13  ;;  %v277_v35 = vsel %vm274_vm3, %v270_v22, %v271_v15 }
   0x9   :  { %v1264_v30 = vadd.s32 4294967295, %v54_v25  ;;  %v1268_v32 = vadd.s32 1, %v47_v26  ;;  %v117_v33 = vsel %vm97_vm4, %v92_v23, 0.0  ;;  %v61_v37 = vand.u32 15, %v35_v29 }
   0xa   :  { %v121_v36 = vpack.c.bf16 %v91_v27, %v117_v33  ;;  %v273_v42 = vrot.slane %v1222_v7, 1  ;;  %v318_v43 = vsel %vm159_vm0, %v982_v17, 0  ;;  %1083 = vmatpush3.bf16.msra.mxu1 %v1142_v52  ;;  %v397_v55 = vadd.s32 4294967294, %v40_v19 }
   0xb   :  { %vm99_vm5 = vcmp.ge.s32.totalorder %v1264_v30, 0  ;;  %vm288_vm6 = vcmp.lt.s32.totalorder %v1268_v32, 16  ;;  %v1285_v44 = vadd.s32 1, %v61_v37  ;;  %1088 = vmatprep.subr.bf16.mxu1 %v1312_v53  ;;  %v399_v57 = vadd.s32 4294967294, %v54_v25 }
   0xc   :  { %v119_v38 = vsel %vm99_vm5, %v90_v28, 0.0  ;;  %v304_v39 = vsel %vm288_vm6, %v276_v31, 0.0  ;;  %1062 = vmatprep.mubr.msk.bf16.mxu0 %vm152_vm1, %v121_v36  ;;  %v278_v45 = vsel %vm274_vm3, %v273_v42, %v270_v22  ;;  %v275_v46 = vsel %vm274_vm3, %v272_v18, %v273_v42 }
   0xd   :  { %v122_v40 = vpack.c.bf16 %v89_v34, %v119_v38  ;;  %v307_v41 = vpack.c.bf16 %v304_v39, %v277_v35  ;;  %vm290_vm7 = vcmp.lt.s32.totalorder %v1285_v44, 16  ;;  %v1318_v60 = vadd.s32 2, %v61_v37  ;;  %v1145_v44 = vld [vmem:[%s1476_s3 + $0x30] sm:$0xff]  }
   0xe   :  { %v306_v47 = vsel %vm290_vm7, %v278_v45, 0.0  ;;  %vm392_vm8 = vcmp.lt.s32.totalorder %v1233_v12, 2  ;;  %v1321_v63 = vadd.s32 2, %v47_v26  ;;  %vm401_vm10 = vcmp.ge.s32.totalorder %v397_v55, 0 }
   0xf   :  { %v308_v48 = vpack.c.bf16 %v306_v47, %v275_v46  ;;  %vm403_vm11 = vcmp.ge.s32.totalorder %v399_v57, 0  ;;  %vm761_vm12 = vcmp.lt.s32.totalorder %v1233_v12, 6  ;;  %vm777_vm13 = vcmp.lt.s32.totalorder %v1318_v60, 16  ;;  %v1144_v47 = vld [vmem:[%s1476_s3 + $0x28] sm:$0xff]   ;;  %v1146_v60 = vld [vmem:[%s1476_s3 + $0x38] sm:$0xff]   ;;  %v1147_v12 = vld [vmem:[%s1476_s3 + $0x40] sm:$0xff]  }
  0x10   :  { %vm775_vm14 = vcmp.lt.s32.totalorder %v1321_v63, 16  ;;  %v1148_v63 = vld [vmem:[%s1476_s3 + $0x48] sm:$0xff]  }
  0x12   :  { %1063 = vmatmul.mubr.msk.bf16.vlgmr.msra.gmra.mrb[0].mxu0 %vm152_vm1, %v122_v40 }
  0x13   :  { %1067 = vmatpush3.bf16.msra.mxu0 %v318_v43  ;;  %1068 = vmatprep.mubr.msk.bf16.mxu0 %vm152_vm1, %v307_v41 }
  0x14   :  { %1072 = vmatprep.subr.bf16.mxu0 %v1139_v49 }
  0x1e   :  { %1069 = vmatmul.mubr.msk.bf16.vlgmr.msra.gmra.mrb[0].mxu0 %vm152_vm1, %v308_v48 }
  0x1f   :  { %1073 = vmatpush3.bf16.msra.mxu0 %v1139_v49 }
  0x20   :  { %1074 = vmatprep.subr.bf16.mxu0 %v1141_v51 }
  0x23   :  { %1075 = vmatpush3.bf16.msra.mxu0 %v1141_v51 }
  0xf1   :  { %v1070_v56 = vpop.f32.mrb[0].mxu0 }
  0xf2   :  { %v382_v58 = vadd.f32 %v1070_v56, %v985_v54  ;;  %v354_v59 = vpop.f32.mrb[1].mxu0 }
  0xf3   :  { %v380_v61 = vadd.f32 %v985_v54, %v354_v59  ;;  %v1071_v62 = vpop.f32.mrb[2].mxu0 }
  0xf4   :  { %v1323_v0 = vmax.f32 %v382_v58, 0.0  ;;  %v383_v1 = vadd.f32 %v1071_v62, %v985_v54  ;;  %v357_v4 = vpop.f32.mrb[3].mxu0 }
  0xf5   :  { %v1325_v5 = vmax.f32 %v380_v61, 0.0  ;;  %v381_v8 = vadd.f32 %v985_v54, %v357_v4 }
  0xf6   :  { %v433_v9 = vrot.slane %v1323_v0, 7  ;;  %v669_v10 = vrot.slane %v1323_v0, 1  ;;  %v759_v11 = vrot.slane %v1323_v0, 2  ;;  %v1331_v13 = vmax.f32 %v383_v1, 0.0 }
  0xf7   :  { %v385_v14 = vmax.f32 %v381_v8, 0.0  ;;  %v431_v15 = vrot.slane %v1325_v5, 7  ;;  %v388_v16 = vrot.slane %v1325_v5, 6  ;;  %v390_v17 = vrot.slane %v1323_v0, 6 }
  0xf8   :  { %v434_v18 = vrot.slane %v1331_v13, 7  ;;  %v670_v19 = vrot.slane %v1331_v13, 1  ;;  %v760_v20 = vrot.slane %v1331_v13, 2  ;;  %v391_v21 = vrot.slane %v1331_v13, 6 }
  0xf9   :  { %v432_v22 = vrot.slane %v385_v14, 7  ;;  %v389_v23 = vrot.slane %v385_v14, 6  ;;  %v589_v25 = vpack.c.bf16 %v385_v14, %v1325_v5  ;;  %v590_v26 = vpack.c.bf16 %v1331_v13, %v1323_v0 }
  0xfa   :  { %v438_v27 = vsel %vm88_vm2, %v434_v18, %v431_v15  ;;  %v396_v28 = vsel %vm392_vm8, %v391_v21, %v388_v16  ;;  %v435_v29 = vsel %vm88_vm2, %v433_v9, %v434_v18  ;;  %v393_v31 = vsel %vm392_vm8, %v390_v17, %v391_v21 }
  0xfb   :  { %v437_v33 = vsel %vm88_vm2, %v431_v15, %v432_v22  ;;  %v439_v34 = vsel %vm97_vm4, %v438_v27, 0.0  ;;  %v395_v35 = vsel %vm392_vm8, %v388_v16, %v389_v23  ;;  %v421_v36 = vsel %vm401_vm10, %v396_v28, 0.0 }
  0xfc   :  { %v443_v37 = vpack.c.bf16 %v437_v33, %v439_v34  ;;  %v425_v38 = vpack.c.bf16 %v395_v35, %v421_v36  ;;  %v436_v39 = vsel %vm88_vm2, %v432_v22, %v433_v9  ;;  %v394_v40 = vsel %vm392_vm8, %v389_v23, %v390_v17 }
  0xfd   :  { %v441_v41 = vsel %vm99_vm5, %v436_v39, 0.0  ;;  %v423_v42 = vsel %vm403_vm11, %v394_v40, 0.0  ;;  %v667_v24 = vrot.slane %v1325_v5, 1  ;;  %v668_v43 = vrot.slane %v385_v14, 1 }
  0xfe   :  { %1076 = vmatprep.mubr.msk.bf16.mxu0 %vm462_vm9, %v443_v37  ;;  %1084 = vmatprep.mubr.msk.bf16.mxu1 %vm462_vm9, %v425_v38  ;;  %v444_v45 = vpack.c.bf16 %v435_v29, %v441_v41  ;;  %v426_v46 = vpack.c.bf16 %v393_v31, %v423_v42  ;;  %v671_v48 = vsel %vm274_vm3, %v669_v10, %v670_v19  ;;  %v757_v30 = vrot.slane %v1325_v5, 2 }
  0xff   :  { %v672_v49 = vsel %vm274_vm3, %v668_v43, %v669_v10  ;;  %v673_v50 = vsel %vm274_vm3, %v667_v24, %v668_v43  ;;  %v674_v51 = vsel %vm274_vm3, %v670_v19, %v667_v24  ;;  %v758_v52 = vrot.slane %v385_v14, 2 }
 0x100   :  { %1077 = vmatmul.mubr.msk.bf16.vlgmr.msra.gmra.mrb[4].mxu0 %vm462_vm9, %v444_v45  ;;  %1085 = vmatmul.mubr.msk.bf16.vlgmr.msra.gmra.mrb[0].mxu1 %vm462_vm9, %v426_v46  ;;  %v676_v54 = vsel %vm288_vm6, %v672_v49, 0.0  ;;  %v678_v55 = vsel %vm290_vm7, %v674_v51, 0.0  ;;  %v762_v56 = vsel %vm761_vm12, %v759_v11, %v760_v20  ;;  %v765_v57 = vsel %vm761_vm12, %v760_v20, %v757_v30 }
 0x101   :  { %1089 = vmatpush3.bf16.msra.mxu1 %v1312_v53  ;;  %1092 = vmatprep.mubr.msk.bf16.mxu1 %vm462_vm9, %v589_v25  ;;  %v679_v58 = vpack.c.bf16 %v676_v54, %v673_v50  ;;  %v680_v59 = vpack.c.bf16 %v678_v55, %v671_v48  ;;  %v763_v61 = vsel %vm761_vm12, %v758_v52, %v759_v11  ;;  %v793_v32 = vsel %vm777_vm13, %v765_v57, 0.0  ;;  %v1022_v11 = vld [vmem:[%s1478_s4] ss:$0 sm:$0xff] }
 0x102   :  { %1090 = vmatprep.subr.bf16.mxu1 %v1144_v47  ;;  %v764_v62 = vsel %vm761_vm12, %v757_v30, %v758_v52  ;;  %v791_v53 = vsel %vm775_vm14, %v763_v61, 0.0  ;;  %v795_v0 = vpack.c.bf16 %v793_v32, %v762_v56 }
 0x103   :  { %v794_v1 = vpack.c.bf16 %v791_v53, %v764_v62 }
 0x105   :  { %1091 = vmatpush3.bf16.msra.mxu1 %v1144_v47 }
 0x106   :  { %1096 = vmatprep.subr.bf16.mxu1 %v1145_v44 }
 0x10c   :  { %1093 = vmatmul.mubr.msk.bf16.vlgmr.msra.gmra.mrb[0].mxu1 %vm462_vm9, %v590_v26 }
 0x10d   :  { %1097 = vmatpush3.bf16.msra.mxu1 %v1145_v44  ;;  %1100 = vmatprep.mubr.msk.bf16.mxu1 %vm462_vm9, %v679_v58 }
 0x10e   :  { %1098 = vmatprep.subr.bf16.mxu1 %v1146_v60 }
 0x111   :  { %1099 = vmatpush3.bf16.msra.mxu1 %v1146_v60 }
 0x112   :  { %1104 = vmatprep.subr.bf16.mxu1 %v1147_v12 }
 0x118   :  { %1101 = vmatmul.mubr.msk.bf16.vlgmr.msra.gmra.mrb[0].mxu1 %vm462_vm9, %v680_v59 }
 0x119   :  { %1105 = vmatpush3.bf16.msra.mxu1 %v1147_v12  ;;  %1108 = vmatprep.mubr.msk.bf16.mxu1 %vm462_vm9, %v794_v1 }
 0x11a   :  { %1106 = vmatprep.subr.bf16.mxu1 %v1148_v63 }
 0x11d   :  { %1107 = vmatpush3.bf16.msra.mxu1 %v1148_v63 }
 0x124   :  { %1109 = vmatmul.mubr.msk.bf16.vlgmr.msra.gmra.mrb[0].mxu1 %vm462_vm9, %v795_v0 }
 0x1d3   :  { %v1078_v4 = vpop.f32.mrb[4].mxu0 }
 0x1d4   :  { %v503_v5 = vpop.f32.mrb[5].mxu0 }
 0x1d5   :  { %v1079_v8 = vpop.f32.mrb[6].mxu0 }
 0x1d6   :  { %v506_v9 = vpop.f32.mrb[7].mxu0 }
 0x1f7   :  { %v1110_v10 = vpop.f32.mrb[0].mxu1 }
 0x1f8   :  { %v1112_v13 = vadd.f32 %v1110_v10, %v1078_v4  ;;  %v853_v14 = vpop.f32.mrb[1].mxu1  ;;  %v1023_v4 = vld [vmem:[%s1479_s5] ss:$0 sm:$0xff] }
 0x1f9   :  { %v1113_v15 = vadd.f32 %v853_v14, %v503_v5  ;;  %v1111_v16 = vpop.f32.mrb[2].mxu1 }
 0x1fa   :  { %v881_v17 = vadd.f32 %v1112_v13, %v1022_v11  ;;  %v1114_v18 = vadd.f32 %v1111_v16, %v1079_v8  ;;  %v856_v19 = vpop.f32.mrb[3].mxu1 }
 0x1fb   :  { %v879_v20 = vadd.f32 %v1113_v15, %v1022_v11  ;;  %v1115_v21 = vadd.f32 %v856_v19, %v506_v9  ;;  %v1024_v9 = vld [vmem:[%s1480_s6] ss:$0 sm:$0xff] }
 0x1fc   :  { %v882_v22 = vadd.f32 %v1114_v18, %v1022_v11  ;;  %v1423_v23 = vadd.f32 %v881_v17, %v1217_v6 }
 0x1fd   :  { %v880_v25 = vadd.f32 %v1115_v21, %v1022_v11  ;;  %v1426_v26 = vadd.f32 %v879_v20, %v1203_v2 }
 0x1fe   :  { %v1429_v27 = vadd.f32 %v882_v22, %v1222_v7  ;;  %v893_v28 = vsel %vm152_vm1, %v1423_v23, 0.0  ;;  %v905_v36 = vmul.f32 %v1423_v23, %v1423_v23 }
 0x1ff   :  { %v884_v29 = vadd.f32 %v880_v25, %v1208_v3  ;;  %894 = vadd.xlane.f32.xlu1 %v893_v28  ;;  %v887_v31 = vsel %vm152_vm1, %v1426_v26, 0.0  ;;  %v903_v7 = vmul.f32 %v1426_v26, %v1426_v26 }
 0x200   :  { %888 = vadd.xlane.f32.xlu0 %v887_v31  ;;  %v896_v6 = vsel %vm152_vm1, %v1429_v27, 0.0  ;;  %v906_v3 = vmul.f32 %v1429_v27, %v1429_v27  ;;  %v913_v38 = vsel %vm152_vm1, %v905_v36, 0.0 }
 0x201   :  { %v904_v33 = vmul.f32 %v884_v29, %v884_v29  ;;  %v890_v2 = vsel %vm152_vm1, %v884_v29, 0.0  ;;  %v907_v35 = vsel %vm152_vm1, %v903_v7, 0.0 }
 0x202   :  { %v916_v37 = vsel %vm152_vm1, %v906_v3, 0.0 }
 0x203   :  { %897 = vadd.xlane.f32.xlu1 %v896_v6  ;;  %v910_v34 = vsel %vm152_vm1, %v904_v33, 0.0 }
 0x204   :  { %891 = vadd.xlane.f32.xlu0 %v890_v2 }
 0x207   :  { %911 = vadd.xlane.f32.xlu1 %v910_v34 }
 0x208   :  { %908 = vadd.xlane.f32.xlu0 %v907_v35 }
 0x20b   :  { %917 = vadd.xlane.f32.xlu1 %v916_v37 }
 0x20c   :  { %914 = vadd.xlane.f32.xlu0 %v913_v38 }
 0x28c   :  { %v895_v39 = vpop.xlane.xlu1 %894 }
 0x28d   :  { %v889_v40 = vpop.xlane.xlu0 %888  ;;  %v901_v49 = vmul.f32 0.125, %v895_v39 }
 0x28e   :  { %v899_v24 = vmul.f32 0.125, %v889_v40 }
 0x28f   :  { %v925_v61 = vmul.f32 %v901_v49, %v901_v49  ;;  %v933_v15 = vsub.f32 %v1423_v23, %v901_v49 }
 0x290   :  { %v898_v41 = vpop.xlane.xlu1 %897  ;;  %v923_v50 = vmul.f32 %v899_v24, %v899_v24  ;;  %v931_v63 = vsub.f32 %v1426_v26, %v899_v24 }
 0x291   :  { %v892_v42 = vpop.xlane.xlu0 %891  ;;  %v902_v47 = vmul.f32 0.125, %v898_v41 }
 0x292   :  { %v900_v43 = vmul.f32 0.125, %v892_v42 }
 0x293   :  { %v926_v56 = vmul.f32 %v902_v47, %v902_v47  ;;  %v934_v11 = vsub.f32 %v1429_v27, %v902_v47 }
 0x294   :  { %v924_v45 = vmul.f32 %v900_v43, %v900_v43  ;;  %v912_v46 = vpop.xlane.xlu1 %911  ;;  %v932_v60 = vsub.f32 %v884_v29, %v900_v43 }
 0x295   :  { %v920_v48 = vmul.f32 0.125, %v912_v46  ;;  %v909_v30 = vpop.xlane.xlu0 %908 }
 0x296   :  { %v919_v51 = vmul.f32 0.125, %v909_v30 }
 0x297   :  { %v928_v52 = vsub.f32 %v920_v48, %v924_v45 }
 0x298   :  { %v927_v54 = vsub.f32 %v919_v51, %v923_v50  ;;  %v918_v55 = vpop.xlane.xlu1 %917 }
 0x299   :  { %v936_v57 = vadd.f32 1e-05, %v928_v52  ;;  %v922_v58 = vmul.f32 0.125, %v918_v55  ;;  %v915_v59 = vpop.xlane.xlu0 %914 }
 0x29a   :  { %v935_v32 = vadd.f32 1e-05, %v927_v54  ;;  %v921_v44 = vmul.f32 0.125, %v915_v59 }
 0x29b   :  { %1149 = vrsqrt.f32 %v936_v57  ;;  %v930_v62 = vsub.f32 %v922_v58, %v926_v56 }
 0x29c   :  { %1151 = vrsqrt.f32 %v935_v32  ;;  %v929_v53 = vsub.f32 %v921_v44, %v925_v61 }
 0x29d   :  { %v938_v0 = vadd.f32 1e-05, %v930_v62 }
 0x29e   :  { %v937_v1 = vadd.f32 1e-05, %v929_v53 }
 0x29f   :  { %1153 = vrsqrt.f32 %v938_v0 }
 0x2a0   :  { %1155 = vrsqrt.f32 %v937_v1 }
 0x2a5   :  { %v1150_v12 = vpop.eup %1149 }
 0x2a6   :  { %v1152_v5 = vpop.eup %1151  ;;  %v944_v8 = vmul.f32 %v1150_v12, %v932_v60 }
 0x2a7   :  { %v943_v10 = vmul.f32 %v1152_v5, %v931_v63 }
 0x2a8   :  { %v955_v13 = vmul.f32 %v1023_v4, %v944_v8 }
 0x2a9   :  { %v1154_v14 = vpop.eup %1153  ;;  %v954_v16 = vmul.f32 %v1023_v4, %v943_v10 }
 0x2aa   :  { %v1156_v17 = vpop.eup %1155  ;;  %v966_v18 = vadd.f32 %v1024_v9, %v955_v13  ;;  %v946_v19 = vmul.f32 %v1154_v14, %v934_v11 }
 0x2ab   :  { %v965_v20 = vadd.f32 %v1024_v9, %v954_v16  ;;  %v945_v21 = vmul.f32 %v1156_v17, %v933_v15 }
 0x2ac   :  { %970 = vst.msk [vmem:[%s1481_s7 + $0x8] sm:$0xff] %vm152_vm1, %v966_v18  ;;  %v957_v22 = vmul.f32 %v1023_v4, %v946_v19 }
 0x2ad   :  { %969 = vst.msk [vmem:[%s1481_s7] sm:$0xff] %vm152_vm1, %v965_v20  ;;  %v956_v25 = vmul.f32 %v1023_v4, %v945_v21 }
 0x2ae   :  { %v968_v26 = vadd.f32 %v1024_v9, %v957_v22 }
 0x2af   :  { %v967_v23 = vadd.f32 %v1024_v9, %v956_v25 }
 0x2b0   :  { %972 = vst.msk [vmem:[%s1481_s7 + $0x18] sm:$0xff] %vm152_vm1, %v968_v26 }
 0x2b1   :  { %971 = vst.msk [vmem:[%s1481_s7 + $0x10] sm:$0xff] %vm152_vm1, %v967_v23 }

</bundles_post_ra>
